<compile_context>
chip_gen: v7x
topology: tpu7x:2x2x1
jax: 0.10.0
libtpu: 0.0.40
codegen_flags: <defaults>
</compile_context>

<pallas_src>
import functools

import jax
import jax.numpy as jnp
import numpy as np
from jax.experimental import pallas as pl
from jax.experimental.pallas import tpu as pltpu


def _round_up(x, mult):
    return ((x + mult - 1) // mult) * mult


def _pool_max(y, p_cols, pool_size):
    """Max over k static, 128-aligned lane slices of width p_cols."""
    r = y[:, 0:p_cols]
    for j in range(1, pool_size):
        r = jnp.maximum(r, y[:, j * p_cols:(j + 1) * p_cols])
    return r


def _maxout_kernel_fused(x_ref, w_ref, b_ref, o_ref, *, p_cols, pool_size):
    """Fast path (single contraction step): no accumulator scratch.

    x_ref: (tn, d)     activation row tile
    w_ref: (d, k*P)    fused, pool-padded weight
    b_ref: (1, k*P)    fused, pool-padded bias (f32)
    o_ref: (tn, P)     lane-dense output tile (wrapper slices [:, :m])
    """
    y = jnp.dot(x_ref[...], w_ref[...], preferred_element_type=jnp.float32)
    y = y + b_ref[...].astype(jnp.float32)
    o_ref[...] = _pool_max(y, p_cols, pool_size).astype(o_ref.dtype)


def _maxout_kernel_acc(x_ref, w_ref, b_ref, o_ref, acc_ref, *, p_cols, pool_size):
    """Tiled-contraction path with a resident f32 accumulator.

    acc_ref: (tn, k*P) f32, resident across the d grid axis. Bias is folded
    into the init so there is no separate epilogue add.
    """
    kk = pl.program_id(1)

    @pl.when(kk == 0)
    def _():
        acc_ref[...] = jnp.broadcast_to(b_ref[...].astype(jnp.float32),
                                        acc_ref.shape)

    acc_ref[...] += jnp.dot(x_ref[...], w_ref[...],
                            preferred_element_type=jnp.float32)

    @pl.when(kk == pl.num_programs(1) - 1)
    def _():
        o_ref[...] = _pool_max(acc_ref[...], p_cols, pool_size).astype(o_ref.dtype)


def prepare_maxout_params(weight, bias, d_out, pool_size, operand_dtype=None):
    """One-time rearrangement of torch Linear params (hoisted out of forward).

    torch: lin[..., i*k + j] = x @ weight[i*k + j, :] + bias[i*k + j]; Maxout
    takes max over j. We build w_fused (d, k*P) / b_fused (1, k*P) with
    P = round_up(m, 128) so column j*P + i equals torch column i*k + j and
    columns [j*P + m, (j+1)*P) are zero padding. A single matmul then yields
    pool block j contiguously in 128-aligned columns [j*P, (j+1)*P).
    """
    mk, d = weight.shape
    assert mk == d_out * pool_size
    p_cols = _round_up(d_out, 128)

    w = weight.reshape(d_out, pool_size, d)        # (m, k, d): w[i, j] = row i*k+j
    w = jnp.transpose(w, (1, 0, 2))                # (k, m, d)
    b = bias.reshape(d_out, pool_size).T           # (k, m)
    if p_cols != d_out:
        w = jnp.pad(w, ((0, 0), (0, p_cols - d_out), (0, 0)))
        b = jnp.pad(b, ((0, 0), (0, p_cols - d_out)))
    w = jnp.transpose(w, (2, 0, 1)).reshape(d, pool_size * p_cols)   # (d, k*P)
    b = b.reshape(1, pool_size * p_cols).astype(jnp.float32)

    if operand_dtype is not None:
        w = w.astype(operand_dtype)
    return w, b


def _vmem_capacity_bytes():
    try:
        return int(pltpu.get_tpu_info().vmem_capacity_bytes)
    except Exception:
        return 64 * 1024 * 1024  # conservative (v7x-sized) fallback


def _choose_tiles(n_rows, d, kmp, p_cols, xb, wb, ob, row_tile, budget):
    """Pick (row tile tn, contraction tile td) that fit the VMEM budget."""

    def need(tn, td, nsteps):
        acc = tn * kmp * 4 if nsteps > 1 else 0
        return (2 * tn * td * xb          # double-buffered x tiles
                + 2 * td * kmp * wb       # double-buffered weight tiles
                + 2 * kmp * 4             # bias
                + 2 * tn * p_cols * ob    # double-buffered output tiles
                + acc)                    # resident f32 accumulator

    def pick_td(tn):
        if need(tn, d, 1) <= budget:
            return d, True
        cand = (d // 128) * 128
        while cand >= 128:
            if d % cand == 0 and need(tn, cand, d // cand) <= budget:
                return cand, True
            cand -= 128
        return d, False

    tn = min(row_tile, n_rows)
    if tn >= n_rows:
        tn = n_rows
        if n_rows >= 16:
            # >= 2 row tiles so both v7x TensorCores get work; ~0.35us extra
            # grid step on single-core v5e/v6e (negligible).
            tn = _round_up(-(-n_rows // 2), 8)
    else:
        tn = _round_up(tn, 8)
        if tn >= n_rows:
            tn = n_rows

    while True:
        td, ok = pick_td(tn)
        if ok or tn <= 8:
            return tn, td
        new_tn = max(8, (tn // 2) // 8 * 8)
        if new_tn >= tn:
            return tn, td
        tn = new_tn


def maxout(x, w_fused, b_fused, d_out, pool_size, *,
           row_tile=1024, operand_dtype=None):
    """Pallas Maxout forward.

    Args:
      x:         (..., d) input (PyTorch Linear layout).
      w_fused:   (d, k*P) weight from prepare_maxout_params.
      b_fused:   (1, k*P) f32 bias from prepare_maxout_params.
      d_out:     m, features after Maxout.
      pool_size: k, pool size.
      row_tile:  target row tile (auto-shrunk to the VMEM budget).
      operand_dtype: e.g. jnp.bfloat16 for MXU-peak operands (f32 accumulation
        is kept). Prefer passing x already in bf16 to avoid a wrapper cast pass.
    Returns:
      (..., m) output with x's dtype.
    """
    orig_shape = x.shape
    d = orig_shape[-1]
    kmp = w_fused.shape[1]
    assert w_fused.shape[0] == d and kmp % pool_size == 0
    p_cols = kmp // pool_size
    assert p_cols >= d_out and p_cols % 128 == 0

    n_rows = int(np.prod(orig_shape[:-1])) if len(orig_shape) > 1 else 1
    x2 = x.reshape(n_rows, d)
    if operand_dtype is not None and x2.dtype != operand_dtype:
        x2 = x2.astype(operand_dtype)

    xb = x2.dtype.itemsize
    wb = w_fused.dtype.itemsize
    ob = x.dtype.itemsize

    capacity = _vmem_capacity_bytes()
    budget = int(0.75 * capacity)

    tn, td = _choose_tiles(n_rows, d, kmp, p_cols, xb, wb, ob, row_tile, budget)
    d_steps = d // td
    grid_rows = -(-n_rows // tn)
    grid = (grid_rows, d_steps)

    need = (2 * tn * td * xb + 2 * td * kmp * wb + 2 * kmp * 4
            + 2 * tn * p_cols * ob + (tn * kmp * 4 if d_steps > 1 else 0))
    vmem_limit = int(min(0.9 * capacity, max(2 * need, 32 * 1024 * 1024)))

    # Weight is re-streamed once per row tile only when the d axis is tiled;
    # with a single d step its block index never changes so it is fetched once.
    weight_streams = grid_rows if d_steps > 1 else 1
    cost = pl.CostEstimate(
        flops=2 * n_rows * d * kmp,
        transcendentals=0,
        bytes_accessed=(n_rows * d * xb + weight_streams * d * kmp * wb
                        + kmp * 4 + n_rows * p_cols * ob),
    )

    if d_steps == 1:
        kernel = functools.partial(_maxout_kernel_fused,
                                   p_cols=p_cols, pool_size=pool_size)
        scratch = []
    else:
        kernel = functools.partial(_maxout_kernel_acc,
                                   p_cols=p_cols, pool_size=pool_size)
        scratch = [pltpu.VMEM((tn, kmp), jnp.float32)]

    def build_call(single_buffer_consts):
        if single_buffer_consts:
            # Constant blocks (index never changes): single-buffer to halve
            # their VMEM footprint, buying a larger tn on v7x's 64 MiB.
            w_spec = pl.BlockSpec((td, kmp), lambda i, kk: (kk, 0),
                                  pipeline_mode=pl.Buffered(1))
            b_spec = pl.BlockSpec((1, kmp), lambda i, kk: (0, 0),
                                  pipeline_mode=pl.Buffered(1))
        else:
            w_spec = pl.BlockSpec((td, kmp), lambda i, kk: (kk, 0))
            b_spec = pl.BlockSpec((1, kmp), lambda i, kk: (0, 0))
        return pl.pallas_call(
            kernel,
            out_shape=jax.ShapeDtypeStruct((n_rows, p_cols), x.dtype),
            grid_spec=pltpu.PrefetchScalarGridSpec(
                num_scalar_prefetch=0,
                grid=grid,
                in_specs=[
                    pl.BlockSpec((tn, td), lambda i, kk: (i, kk)),
                    w_spec,
                    b_spec,
                ],
                out_specs=pl.BlockSpec((tn, p_cols), lambda i, kk: (i, 0)),
                scratch_shapes=scratch,
            ),
            compiler_params=pltpu.CompilerParams(
                dimension_semantics=("parallel", "arbitrary"),
                vmem_limit_bytes=vmem_limit,
            ),
            cost_estimate=cost,
        )

    if d_steps == 1:
        try:
            out = build_call(True)(x2, w_fused, b_fused)
        except Exception:
            # Fallback if this JAX build rejects pipeline_mode / Buffered(1).
            out = build_call(False)(x2, w_fused, b_fused)
    else:
        out = build_call(False)(x2, w_fused, b_fused)

    if p_cols != d_out:
        out = out[:, :d_out]
    return out.reshape(*orig_shape[:-1], d_out)


if __name__ == "__main__":
    # Module config: Maxout(d=32, m=16, k=4); input (batch=2, seq=8, d=32).
    d, m, k = 32, 16, 4
    batch, seq = 2, 8

    key = jax.random.PRNGKey(0)
    kx, kw, kb = jax.random.split(key, 3)

    x = jax.random.normal(kx, (batch, seq, d), dtype=jnp.float32)
    # Deterministic init mimicking nn.Linear's uniform(-1/sqrt(d), 1/sqrt(d)).
    bound = 1.0 / np.sqrt(d)
    weight = jax.random.uniform(kw, (m * k, d), minval=-bound, maxval=bound,
                                dtype=jnp.float32)
    bias = jax.random.uniform(kb, (m * k,), minval=-bound, maxval=bound,
                              dtype=jnp.float32)

    # Parameter rearrangement hoisted out of the forward path (one-time cost).
    w_fused, b_fused = prepare_maxout_params(weight, bias, d_out=m, pool_size=k)

    out = maxout(x, w_fused, b_fused, d_out=m, pool_size=k)
    out = jax.block_until_ready(out)

    # Pure-JAX reference (mirrors the PyTorch forward exactly).
    lin = x.reshape(-1, d) @ weight.T + bias
    ref = lin.reshape(batch, seq, m, k).max(axis=-1)

    assert out.shape == (batch, seq, m), out.shape
    np.testing.assert_allclose(np.asarray(out), np.asarray(ref),
                               rtol=1e-5, atol=1e-5)
    print("KERNEL_OK")
</pallas_src>

<mosaic_0001>
module attributes {stable_mosaic.version = 11 : i64} {
  func.func @_maxout_kernel_fused(%arg0: i32, %arg1: i32, %arg2: memref<8x32xf32, #tpu.memory_space<vmem>>, %arg3: memref<32x512xf32, #tpu.memory_space<vmem>>, %arg4: memref<1x512xf32, #tpu.memory_space<vmem>>, %arg5: memref<8x128xf32, #tpu.memory_space<vmem>>) attributes {dimension_semantics = [#tpu.dimension_semantics<parallel>, #tpu.dimension_semantics<arbitrary>], iteration_bounds = array<i64: 2, 1>, scalar_prefetch = 0 : i64, scratch_operands = 0 : i64, tpu.core_type = #tpu.core_type<tc>, window_params = [{transform_indices = @transform_0, window_bounds = array<i64: 8, 32>}, {pipeline_mode = #tpu.pipeline_mode<synchronous>, transform_indices = @transform_1, window_bounds = array<i64: 32, 512>}, {pipeline_mode = #tpu.pipeline_mode<synchronous>, transform_indices = @transform_2, window_bounds = array<i64: 1, 512>}, {transform_indices = @transform_3, window_bounds = array<i64: 8, 128>}]} {
    %c0 = arith.constant 0 : index
    %c0_0 = arith.constant 0 : index
    %0 = vector.load %arg2[%c0, %c0_0] : memref<8x32xf32, #tpu.memory_space<vmem>>, vector<8x32xf32>
    %c0_1 = arith.constant 0 : index
    %c0_2 = arith.constant 0 : index
    %1 = vector.load %arg3[%c0_1, %c0_2] : memref<32x512xf32, #tpu.memory_space<vmem>>, vector<32x512xf32>
    %cst = arith.constant dense<0.000000e+00> : vector<8x512xf32>
    %2 = tpu.matmul %0, %1, %cst {dimension_numbers = #tpu.dot_dimension_numbers<[1], [0], [0], [1], [0, 0, 1, 1], [], []>} : vector<8x32xf32>, vector<32x512xf32>, vector<8x512xf32> -> vector<8x512xf32>
    %c0_3 = arith.constant 0 : index
    %c0_4 = arith.constant 0 : index
    %3 = vector.load %arg4[%c0_3, %c0_4] : memref<1x512xf32, #tpu.memory_space<vmem>>, vector<1x512xf32>
    %4 = vector.broadcast %3 : vector<1x512xf32> to vector<8x512xf32>
    %5 = arith.addf %2, %4 : vector<8x512xf32>
    %6 = vector.extract_strided_slice %5 {offsets = [0, 0], sizes = [8, 128], strides = [1, 1]} : vector<8x512xf32> to vector<8x128xf32>
    %7 = vector.extract_strided_slice %5 {offsets = [0, 128], sizes = [8, 128], strides = [1, 1]} : vector<8x512xf32> to vector<8x128xf32>
    %8 = arith.maximumf %6, %7 : vector<8x128xf32>
    %9 = vector.extract_strided_slice %5 {offsets = [0, 256], sizes = [8, 128], strides = [1, 1]} : vector<8x512xf32> to vector<8x128xf32>
    %10 = arith.maximumf %8, %9 : vector<8x128xf32>
    %11 = vector.extract_strided_slice %5 {offsets = [0, 384], sizes = [8, 128], strides = [1, 1]} : vector<8x512xf32> to vector<8x128xf32>
    %12 = arith.maximumf %10, %11 : vector<8x128xf32>
    %c0_5 = arith.constant 0 : index
    %c0_6 = arith.constant 0 : index
    %13 = vector.load %arg5[%c0_5, %c0_6] : memref<8x128xf32, #tpu.memory_space<vmem>>, vector<8x128xf32>
    tpu.vector_store %arg5[%c0_5, %c0_6], %12 {strides = array<i32>} : memref<8x128xf32, #tpu.memory_space<vmem>>, vector<8x128xf32>,
    return
  }
  func.func @transform_0(%arg0: i32, %arg1: i32) -> (i32, i32) {
    %c0_i32 = arith.constant 0 : i32
    return %arg0, %arg1 : i32, i32
  }
  func.func @transform_1(%arg0: i32, %arg1: i32) -> (i32, i32) {
    %c0_i32 = arith.constant 0 : i32
    %c0_i32_0 = arith.constant 0 : i32
    return %arg1, %c0_i32 : i32, i32
  }
  func.func @transform_2(%arg0: i32, %arg1: i32) -> (i32, i32) {
    %c0_i32 = arith.constant 0 : i32
    %c0_i32_0 = arith.constant 0 : i32
    %c0_i32_1 = arith.constant 0 : i32
    return %c0_i32, %c0_i32_0 : i32, i32
  }
  func.func @transform_3(%arg0: i32, %arg1: i32) -> (i32, i32) {
    %c0_i32 = arith.constant 0 : i32
    %c0_i32_0 = arith.constant 0 : i32
    return %arg0, %c0_i32 : i32, i32
  }
}

module attributes {stable_mosaic.version = 11 : i64} {
  func.func @_maxout_kernel_fused(%arg0: i32, %arg1: i32, %arg2: memref<8x32xf32, #tpu.memory_space<vmem>>, %arg3: memref<32x512xf32, #tpu.memory_space<vmem>>, %arg4: memref<1x512xf32, #tpu.memory_space<vmem>>, %arg5: memref<8x128xf32, #tpu.memory_space<vmem>>) attributes {dimension_semantics = [#tpu.dimension_semantics<parallel>, #tpu.dimension_semantics<arbitrary>], iteration_bounds = array<i64: 2, 1>, scalar_prefetch = 0 : i64, scratch_operands = 0 : i64, tpu.core_type = #tpu.core_type<tc>, window_params = [{transform_indices = @transform_0, window_bounds = array<i64: 8, 32>}, {transform_indices = @transform_1, window_bounds = array<i64: 32, 512>}, {pipeline_mode = #tpu.pipeline_mode<synchronous>, transform_indices = @transform_2, window_bounds = array<i64: 1, 512>}, {transform_indices = @transform_3, window_bounds = array<i64: 8, 128>}]} {
    %c0 = arith.constant 0 : index
    %c0_0 = arith.constant 0 : index
    %0 = vector.load %arg2[%c0, %c0_0] : memref<8x32xf32, #tpu.memory_space<vmem>>, vector<8x32xf32>
    %c0_1 = arith.constant 0 : index
    %c0_2 = arith.constant 0 : index
    %1 = vector.load %arg3[%c0_1, %c0_2] : memref<32x512xf32, #tpu.memory_space<vmem>>, vector<32x512xf32>
    %cst = arith.constant dense<0.000000e+00> : vector<8x512xf32>
    %2 = tpu.matmul %0, %1, %cst {dimension_numbers = #tpu.dot_dimension_numbers<[1], [0], [0], [1], [0, 0, 1, 1], [], []>} : vector<8x32xf32>, vector<32x512xf32>, vector<8x512xf32> -> vector<8x512xf32>
    %c0_3 = arith.constant 0 : index
    %c0_4 = arith.constant 0 : index
    %3 = vector.load %arg4[%c0_3, %c0_4] : memref<1x512xf32, #tpu.memory_space<vmem>>, vector<1x512xf32>
    %4 = vector.broadcast %3 : vector<1x512xf32> to vector<8x512xf32>
    %5 = arith.addf %2, %4 : vector<8x512xf32>
    %6 = vector.extract_strided_slice %5 {offsets = [0, 0], sizes = [8, 128], strides = [1, 1]} : vector<8x512xf32> to vector<8x128xf32>
    %7 = vector.extract_strided_slice %5 {offsets = [0, 128], sizes = [8, 128], strides = [1, 1]} : vector<8x512xf32> to vector<8x128xf32>
    %8 = arith.maximumf %6, %7 : vector<8x128xf32>
    %9 = vector.extract_strided_slice %5 {offsets = [0, 256], sizes = [8, 128], strides = [1, 1]} : vector<8x512xf32> to vector<8x128xf32>
    %10 = arith.maximumf %8, %9 : vector<8x128xf32>
    %11 = vector.extract_strided_slice %5 {offsets = [0, 384], sizes = [8, 128], strides = [1, 1]} : vector<8x512xf32> to vector<8x128xf32>
    %12 = arith.maximumf %10, %11 : vector<8x128xf32>
    %c0_5 = arith.constant 0 : index
    %c0_6 = arith.constant 0 : index
    %13 = vector.load %arg5[%c0_5, %c0_6] : memref<8x128xf32, #tpu.memory_space<vmem>>, vector<8x128xf32>
    tpu.vector_store %arg5[%c0_5, %c0_6], %12 {strides = array<i32>} : memref<8x128xf32, #tpu.memory_space<vmem>>, vector<8x128xf32>,
    return
  }
  func.func @transform_0(%arg0: i32, %arg1: i32) -> (i32, i32) {
    %c0_i32 = arith.constant 0 : i32
    return %arg0, %arg1 : i32, i32
  }
  func.func @transform_1(%arg0: i32, %arg1: i32) -> (i32, i32) {
    %c0_i32 = arith.constant 0 : i32
    %c0_i32_0 = arith.constant 0 : i32
    return %arg1, %c0_i32 : i32, i32
  }
  func.func @transform_2(%arg0: i32, %arg1: i32) -> (i32, i32) {
    %c0_i32 = arith.constant 0 : i32
    %c0_i32_0 = arith.constant 0 : i32
    %c0_i32_1 = arith.constant 0 : i32
    return %c0_i32, %c0_i32_0 : i32, i32
  }
  func.func @transform_3(%arg0: i32, %arg1: i32) -> (i32, i32) {
    %c0_i32 = arith.constant 0 : i32
    %c0_i32_0 = arith.constant 0 : i32
    return %arg0, %c0_i32 : i32, i32
  }
}

</mosaic_0001>

<bundles_post_ra>
// kernel: tpu_custom_call.1
= control target key start
LH: loop header
LB: loop body
LE: loop exit
PB: predicated region body
PF: predicated region fallthrough
CT: control target
= control target key end

     0   :  { %8 = vsyncpa [#allocation3], 0  ;;  %s1025_s0 = inlined_call_operand.hbm [shape: f32[16,32], index: 0, kind: input, shape index: {}]   ;;  %s1026_s1 = inlined_call_operand.hbm [shape: f32[32,512], index: 1, kind: input, shape index: {}]   ;;  %s1027_s2 = inlined_call_operand.vmem [shape: f32[1,512], index: 2, kind: input, shape index: {}]   ;;  %s1028_s3 = inlined_call_operand.hbm [shape: f32[16,128], index: 3, kind: output, shape index: {}]  }
   0x1   :  { %10 = vsyncpa [#allocation3 + $0x1], 0 }
   0x2   :  { %11 = vsyncpa [#allocation6], 0 }
   0x3   :  { %12 = vsyncpa [#allocation4], 0 }
   0x4   :  { %14 = vsyncpa [#allocation4 + $0x1], 0  ;;  %s801_s12 = smov 0   ;;  %s803_s13 = smov 0  }
   0x5   :  { %s805_s14 = smov 0   ;;  %s807_s15 = smov 0  }
   0x6   :  { %s809_s16 = smov 0   ;;  %s811_s17 = smov 0  }
   0x7 LB: > { %s520_s18 = sadd.s32 4294967295, %s773_s17   ;;  %s521_s19 = sadd.s32 4294967294, %s773_s17   ;;  %s773_s17 = sphi %s811_s17, %s20_s17   ;;  %s769_s16 = sphi %s809_s16, %s1052_s16   ;;  %s765_s15 = sphi %s807_s15, %s1051_s15   ;;  %s761_s14 = sphi %s805_s14, %s1050_s14   ;;  %s757_s13 = sphi %s803_s13, %s1049_s13   ;;  %s753_s12 = sphi %s801_s12, %s1048_s12  }
   0x8   : > { %p54_p0 = scmp.ne.s32.totalorder %s757_s13, %s753_s12  ;;  %p835_p1 = scmp.eq.s32.totalorder %s520_s18, 0 }
   0x9   : > { %p839_p2 = scmp.eq.s32.totalorder %s520_s18, 1  ;;  %p131_p3 = scmp.eq.s32.totalorder %s521_s19, 1 }
   0xa   : > { %s1033_s20 = scalar_select %p835_p1, 1, 0 }
   0xb   : > { %s1034_s21 = scalar_select %p839_p2, 1, 0 }
   0xc   : > { %p845_p4 = por %p835_p1, %p54_p0  ;;  %p522_p5 = scmp.ge.s32.totalorder %s773_s17, 1 }
   0xd   : > { %p850_p6 = por %p131_p3, %p54_p0  ;;  %p138_p7 = scmp.lt.s32.totalorder %s773_s17, 3 }
   0xe   : > { %s1035_s22 = scalar_select %p845_p4, 1, 0 }
   0xf   : > { %s1036_s23 = scalar_select %p850_p6, 1, 0 }
  0x10   : > { %p855_p8 = pnand %p522_p5, %p138_p7  ;;  %s775_s25 = smov [#allocation5]  }
  0x11   : > { %s154_s26 = sshll.u32 %s775_s25, 4  ;;  %s32_s28 = sadd.s32 1, %s769_s16  ;;  %s155_s26 = int_to_ptr.vmem [resolvable:$true] %s154_s26 }
  0x12   : > { %s1037_s24 = scalar_select %p855_p8, 1, 0 }
  0x13   : > { %p561_p9 = pneg %p855_p8  ;;  %s629_s4 = scalar_lea.hbm %s1026_s1, 2048 }
  0x14   : > { %p630_p12 = scmp.ne.s32.totalorder %s1026_s1, %s629_s4  ;;  %p636_p5 = scmp.lt.u32.totalorder %s629_s4, %s1026_s1 }
  0x15   : > { %p864_p11 = pnand %p561_p9, %p835_p1 }
  0x17   : > { %p631_p13 = pneg %p864_p11 }
  0x19   : > { %p632_p0 = pnand %p631_p13, %p630_p12 }
  0x1b   : > { %p633_p3 = pneg %p632_p0 }
  0x1d   : > { %p638_p7 = pnand %p636_p5, %p633_p3 }
  0x1f   : > { %641 = shalt.err (!%p638_p7)
}
  0x20   : > { %s642_s9 = scalar_lea.vmem %s155_s26, 2048  ;;  %p650_p1 = scmp.lt.s32.totalorder %s155_s26, %s155_s26 }
  0x21   : > { %p643_p9 = scmp.ne.s32.totalorder %s155_s26, %s642_s9  ;;  %p651_p4 = scmp.lt.s32.totalorder %s642_s9, %s642_s9 }
  0x23   : > { %p645_p10 = pnand %p643_p9, %p631_p13  ;;  %p652_p8 = por %p651_p4, %p650_p1 }
  0x25   : > { %p646_p6 = pneg %p645_p10 }
  0x27   : > { %p653_p2 = pnand %p652_p8, %p646_p6 }
  0x29   : > { %656 = shalt.err (!%p653_p2)
}
  0x2a   : > { %s776_s10 = smov 512   ;;  %s777_s11 = smov 32  }
  0x2b   : > { %564 = dma.hbm_to_vmem [thread:$0]  (!%p864_p11), %s1026_s1, 2048, %s155_s26, [#allocation6], %s776_s10, %s776_s10, %s777_s11  }
  0x2c   : > { %p34_p1 = scmp.ge.s32.totalorder %s32_s28, 2  ;;  %s41_s25 = sadd.s32 1, %s761_s14 }
  0x2d   : > { %p48_p2 = scmp.ne.s32.totalorder %s761_s14, %s757_s13  ;;  %p49_p4 = scmp.eq.s32.totalorder %s773_s17, 0 }
  0x2e   : > { %s1054_s28 = smov (%p34_p1, %s32_s28), 0  ;;  %p1040_p8 = scmp.ne.s32.totalorder %s1034_s21, 0 }
  0x2f   : > { %p891_p6 = por %p49_p4, %p48_p2  ;;  %s36_s27 = ssub.s32 %s769_s16, %s1054_s28 }
  0x30   : > { %p897_p10 = por %p1040_p8, %p48_p2  ;;  %p574_p12 = scmp.lt.s32.totalorder %s773_s17, 2 }
  0x31   : > { %p39_p11 = scmp.eq.s32.totalorder %s36_s27, 0  ;;  %s171_s26 = sand.u32 1, %s761_s14  }
  0x32   : > { %s525_s4 = sshll.u32 %s171_s26, 3  ;;  %s526_s6 = sshll.u32 %s769_s16, 7 }
  0x33   : > { %s906_s5 = scalar_select %p39_p11, %s761_s14, %s41_s25  }
  0x34   : > { %s912_s9 = scalar_lea.hbm %s1025_s0, %s526_s6  ;;  %s175_s21 = scalar_lea.vmem [#allocation2], %s525_s4 }
  0x35   : > { %s183_s10 = sshll.u32 %s175_s21, 4  ;;  %p918_p13 = pnand %p574_p12, %p891_p6  ;;  %s914_s10 = int_to_ptr.vmem [resolvable:$true] %s183_s10 }
  0x36   : > { %s172_s18 = scalar_lea.sflag [#allocation3], %s171_s26  ;;  %s657_s19 = scalar_lea.hbm %s912_s9, 128 }
  0x37   : > { %p658_p0 = scmp.ne.s32.totalorder %s912_s9, %s657_s19  ;;  %p659_p3 = pneg %p918_p13 }
  0x38   : > { %s662_s4 = scalar_lea.hbm %s1025_s0, 256  ;;  %p663_p9 = scmp.lt.u32.totalorder %s912_s9, %s1025_s0 }
  0x39   : > { %p660_p5 = pnand %p659_p3, %p658_p0  ;;  %p664_p1 = scmp.lt.u32.totalorder %s662_s4, %s657_s19 }
  0x3a   : > { %p666_p4 = scmp.lt.u32.totalorder %s657_s19, %s912_s9 }
  0x3b   : > { %p661_p7 = pneg %p660_p5  ;;  %p665_p2 = por %p664_p1, %p663_p9 }
  0x3d   : > { %p667_p6 = por %p666_p4, %p665_p2 }
  0x3f   : > { %p668_p8 = pnand %p667_p6, %p661_p7 }
  0x41   : > { %671 = shalt.err (!%p668_p8)
}
  0x42   : > { %s672_s26 = scalar_lea.vmem %s914_s10, 128  ;;  %s778_s7 = smov [#allocation2]  }
  0x43   : > { %p673_p12 = scmp.ne.s32.totalorder %s914_s10, %s672_s26  ;;  %s677_s8 = sshll.u32 %s778_s7, 4  ;;  %s678_s8 = int_to_ptr.vmem [resolvable:$false] %s677_s8 }
  0x44   : > { %s679_s21 = scalar_lea.vmem %s678_s8, 256  ;;  %p680_p5 = scmp.lt.s32.totalorder %s914_s10, %s678_s8 }
  0x45   : > { %p675_p11 = pnand %p673_p12, %p659_p3  ;;  %p681_p9 = scmp.lt.s32.totalorder %s679_s21, %s672_s26 }
  0x47   : > { %p676_p0 = pneg %p675_p11  ;;  %p682_p1 = por %p681_p9, %p680_p5 }
  0x49   : > { %p683_p2 = pnand %p682_p1, %p676_p0 }
  0x4b   : > { %686 = shalt.err (!%p683_p2)
}
  0x4c   : > { %568 = dma.hbm_to_vmem [thread:$0]  (!%p918_p13), %s912_s9, 128, %s914_s10, %s172_s18  }
  0x4d   : > { %p1043_p7 = scmp.ne.s32.totalorder %s1037_s24, 0 }
  0x4e   : > { %s950_s19 = sand.u32 (!%p1043_p7), 1, %s757_s13   ;;  %p1044_p3 = scmp.ne.s32.totalorder (!%p1043_p7), %s1035_s22, 0 }
  0x4f   : > { %192 = sbr.rel (%p1043_p7) target bundleno = 337 (0x151), region = 32  ;;  %s528_s25 = sshll.u32 (!%p1043_p7), %s950_s19, 3 }
  0x50   : > { %s195_s27 = scalar_lea.sflag (!%p1043_p7), [#allocation3], %s950_s19  ;;  %s956_s4 = scalar_lea.vmem (!%p1043_p7), [#allocation2], %s528_s25 }
  0x56   : > { %740 = dma.done.wait (%p1044_p3), %s195_s27, 128  }
  0x57   : > { %742 = vsyncadd (%p1044_p3), %s195_s27, 4294967168  ;;  %p1045_p13 = scmp.ne.s32.totalorder %s1033_s20, 0 }
  0x59   : > { %744 = dma.done.wait (%p1045_p13), [#allocation6], 2048  }
  0x5a   : > { %746 = vsyncadd (%p1045_p13), [#allocation6], 4294965248  ;;  %v779_v0 = vmov 0.0   ;;  %v228_v1 = vld [vmem:[#allocation5 + $0x8] sm:$0xff]  ;;  %v227_v3 = vld [vmem:[#allocation5] sm:$0xff]  ;;  %vm265_vm0 = vcmask 261120   ;;  %v245_v26 = vlaneseq }
  0x5b   : > { %333 = vmatprep.mubr.f32.mxu0 %v779_v0  ;;  %404 = vmatprep.mubr.f32.mxu1 %v779_v0  ;;  %v232_v2 = vld [vmem:[#allocation5 + $0x28] sm:$0xff]  ;;  %v231_v5 = vld [vmem:[#allocation5 + $0x20] sm:$0xff]  ;;  %v230_v6 = vld [vmem:[#allocation5 + $0x18] sm:$0xff]  ;;  %s534_s24 = sshll.u32 %s765_s15, 7  ;;  %s224_s9 = scalar_lea.vmem [#allocation7], %s528_s25 }
  0x5c   : > { %v537_v4 = vpack.c.bf16 %v232_v2, %v228_v1  ;;  %v234_v7 = vld [vmem:[#allocation5 + $0x38] sm:$0xff]  ;;  %v539_v8 = vpack.c.bf16 %v231_v5, %v227_v3  ;;  %v229_v10 = vld [vmem:[#allocation5 + $0x10] sm:$0xff]  ;;  %v236_v12 = vld [vmem:[#allocation5 + $0x48] sm:$0xff]  ;;  %v246_v27 = vshrl.u32 %v245_v26, 7  ;;  %s429_s10 = sshll.u32 %s224_s9, 4  ;;  %s976_s29 = scalar_lea.hbm %s1028_s3, %s534_s24  ;;  %s978_s10 = int_to_ptr.vmem [resolvable:$true] %s429_s10 }
  0x5d   : > { %v545_v9 = vpack.c.bf16 %v234_v7, %v230_v6  ;;  %v233_v11 = vld [vmem:[#allocation5 + $0x30] sm:$0xff]  ;;  %v240_v14 = vld [vmem:[#allocation5 + $0x68] sm:$0xff]  ;;  %v235_v15 = vld [vmem:[#allocation5 + $0x40] sm:$0xff]  ;;  %s416_s6 = scalar_lea.sflag [#allocation4], %s950_s19  ;;  %s687_s26 = scalar_lea.vmem %s978_s10, 128 }
  0x5e   : > { %538 = vmatprep.subr.bf16.mxu0 %v537_v4  ;;  %v547_v13 = vpack.c.bf16 %v233_v11, %v229_v10  ;;  %v239_v16 = vld [vmem:[#allocation5 + $0x60] sm:$0xff]  ;;  %v541_v17 = vpack.c.bf16 %v240_v14, %v236_v12  ;;  %v238_v19 = vld [vmem:[#allocation5 + $0x58] sm:$0xff]  ;;  %v237_v21 = vld [vmem:[#allocation5 + $0x50] sm:$0xff]  ;;  %v247_v28 = vsub.s32 0, %v246_v27  ;;  %v251_v30 = vsub.s32 1, %v246_v27  ;;  %p688_p4 = scmp.ne.s32.totalorder %s978_s10, %s687_s26  ;;  %s780_s15 = smov [#allocation7]  }
  0x5f   : > { %540 = vmatpush1.bf16.msra.mxu0 %v539_v8  ;;  %546 = vmatprep.subr.bf16.mxu1 %v545_v9  ;;  %v543_v18 = vpack.c.bf16 %v239_v16, %v235_v15  ;;  %v242_v20 = vld [vmem:[#allocation5 + $0x78] sm:$0xff]  ;;  %v241_v23 = vld [vmem:[#allocation5 + $0x70] sm:$0xff]  ;;  %v255_v31 = vsub.s32 2, %v246_v27  ;;  %v259_v35 = vsub.s32 3, %v246_v27  ;;  %s691_s7 = sshll.u32 %s780_s15, 4  ;;  %s692_s7 = int_to_ptr.vmem [resolvable:$false] %s691_s7 }
  0x60   : > { %548 = vmatpush1.bf16.msra.mxu1 %v547_v13  ;;  %v549_v22 = vpack.c.bf16 %v242_v20, %v238_v19  ;;  %542 = vmatprep.subr.bf16.mxu0 %v541_v17  ;;  %v551_v24 = vpack.c.bf16 %v241_v23, %v237_v21  ;;  %v226_v25 = vld [vmem:[%s956_s4] sm:$0xff]  ;;  %p689_p6 = pnand %p688_p4, %p897_p10  ;;  %s693_s8 = scalar_lea.vmem %s692_s7, 256 }
  0x61   : > { %v243_v29 = vld [vmem:[%s1027_s2] sm:$0xf]  ;;  %p694_p12 = scmp.lt.s32.totalorder %s978_s10, %s692_s7  ;;  %p695_p11 = scmp.lt.s32.totalorder %s693_s8, %s687_s26 }
  0x62   : > { %550 = vmatprep.subr.bf16.mxu1 %v549_v22  ;;  %v248_v32 = vrot.slane %v243_v29, %v247_v28  ;;  %v252_v33 = vrot.slane %v243_v29, %v251_v30  ;;  %v256_v34 = vrot.slane %v243_v29, %v255_v31  ;;  %v260_v42 = vrot.slane %v243_v29, %v259_v35  ;;  %p690_p8 = pneg %p689_p6 }
  0x63   : > { %544 = vmatpush1.bf16.msra.mxu0 %v543_v18  ;;  %p696_p0 = por %p695_p11, %p694_p12 }
  0x64   : > { %552 = vmatpush1.bf16.msra.mxu1 %v551_v24 }
  0x65   : > { %p697_p5 = pnand %p696_p0, %p690_p8 }
  0x66   : > { %531 = vmatmul.mubr.msk.f32.vlgmr.msra.gmra.mrb[0].mxu0 %vm265_vm0, %v226_v25 }
  0x67   : > { %532 = vmatmul.mubr.msk.f32.vlgmr.msra.gmra.mrb[0].mxu1 %vm265_vm0, %v226_v25 }
 0x139   : > { %v335_v36 = vpop.f32.mrb[0].mxu0 }
 0x13a   : > { %v336_v37 = vadd.f32 %v335_v36, %v248_v32  ;;  %v337_v38 = vpop.f32.mrb[1].mxu0  ;;  %v406_v39 = vpop.f32.mrb[0].mxu1 }
 0x13b   : > { %v338_v40 = vadd.f32 %v337_v38, %v252_v33  ;;  %v407_v41 = vadd.f32 %v406_v39, %v256_v34  ;;  %v408_v43 = vpop.f32.mrb[1].mxu1 }
 0x13c   : > { %v409_v46 = vadd.f32 %v408_v43, %v260_v42 }
 0x13d   : > { %v411_v44 = vmax.f32 %v336_v37, %v338_v40 }
 0x13f   : > { %v412_v45 = vmax.f32 %v411_v44, %v407_v41 }
 0x141   : > { %v413_v47 = vmax.f32 %v412_v45, %v409_v46 }
 0x143   : > { %414 = vst [vmem:[%s224_s9] sm:$0xff] %v413_v47 }
 0x144   : > { %700 = shalt.err (!%p697_p5)
}
 0x145   : > { %s701_s21 = scalar_lea.hbm %s976_s29, 128  ;;  %s705_s27 = scalar_lea.hbm %s1028_s3, 256 }
 0x146   : > { %p702_p9 = scmp.ne.s32.totalorder %s976_s29, %s701_s21  ;;  %p706_p7 = scmp.lt.u32.totalorder %s976_s29, %s1028_s3 }
 0x147   : > { %p707_p3 = scmp.lt.u32.totalorder %s705_s27, %s701_s21  ;;  %p709_p4 = scmp.lt.u32.totalorder %s701_s21, %s976_s29 }
 0x148   : > { %p703_p1 = pnand %p702_p9, %p897_p10 }
 0x149   : > { %p708_p13 = por %p707_p3, %p706_p7 }
 0x14a   : > { %p704_p2 = pneg %p703_p1 }
 0x14b   : > { %p710_p6 = por %p709_p4, %p708_p13 }
 0x14d   : > { %p711_p8 = pnand %p710_p6, %p704_p2 }
 0x14f   : > { %714 = shalt.err (!%p711_p8)
}
 0x150   : > { %559 = dma.vmem_to_hbm [thread:$0]  (%p897_p10), %s978_s10, 128, %s976_s29, %s416_s6  }
 0x151 PF: > { %s441_s22 = sand.u32 1, %s753_s12   ;;  %p1046_p12 = scmp.ne.s32.totalorder %s1036_s23, 0 }
 0x152   : > { %p1047_p11 = scmp.ge.s32.totalorder %s773_s17, 2  ;;  %s442_s24 = scalar_lea.sflag [#allocation4], %s441_s22 }
 0x154   : > { %p570_p0 = pnand %p1047_p11, %p1046_p12 }
 0x156   : > { %748 = dma.done.wait (!%p570_p0), %s442_s24, 128  }
 0x157   : > { %750 = vsyncadd (!%p570_p0), %s442_s24, 4294967168  ;;  %s20_s17 = sadd.s32 1, %s773_s17   ;;  %s1048_s12 = smov %s757_s13 }
 0x158   : > { %p17_p5 = scmp.ge.s32.totalorder %s20_s17, 4   ;;  %s1049_s13 = smov %s761_s14 }
 0x159   : > { %s1050_s14 = smov %s906_s5  ;;  %s1051_s15 = smov %s769_s16 }
 0x15a   : > { %s1052_s16 = smov %s1054_s28  ;;  %19 = sbr.rel (!%p17_p5) target bundleno = 7 (0x7), region = 82 }
 0x161   :  { %447 = vsyncpa [#allocation3], 1 }
 0x162   :  { %449 = vsyncpa [#allocation3 + $0x1], 1 }
 0x163   :  { %450 = vsyncpa [#allocation6], 1 }
 0x164   :  { %451 = vsyncpa [#allocation4], 1 }
 0x165   :  { %453 = vsyncpa [#allocation4 + $0x1], 1 }

// kernel: tpu_custom_call.1
= control target key start
LH: loop header
LB: loop body
LE: loop exit
PB: predicated region body
PF: predicated region fallthrough
CT: control target
= control target key end

     0   :  { %8 = vsyncpa [#allocation3], 0  ;;  %s1025_s0 = inlined_call_operand.hbm [shape: f32[16,32], index: 0, kind: input, shape index: {}]   ;;  %s1026_s1 = inlined_call_operand.hbm [shape: f32[32,512], index: 1, kind: input, shape index: {}]   ;;  %s1027_s2 = inlined_call_operand.vmem [shape: f32[1,512], index: 2, kind: input, shape index: {}]   ;;  %s1028_s3 = inlined_call_operand.hbm [shape: f32[16,128], index: 3, kind: output, shape index: {}]  }
   0x1   :  { %10 = vsyncpa [#allocation3 + $0x1], 0 }
   0x2   :  { %11 = vsyncpa [#allocation6], 0 }
   0x3   :  { %12 = vsyncpa [#allocation4], 0 }
   0x4   :  { %14 = vsyncpa [#allocation4 + $0x1], 0  ;;  %s801_s12 = smov 0   ;;  %s803_s13 = smov 0  }
   0x5   :  { %s805_s14 = smov 0   ;;  %s807_s15 = smov 0  }
   0x6   :  { %s809_s16 = smov 0   ;;  %s811_s17 = smov 0  }
   0x7 LB: > { %s520_s18 = sadd.s32 4294967295, %s773_s17   ;;  %s521_s19 = sadd.s32 4294967294, %s773_s17   ;;  %s773_s17 = sphi %s811_s17, %s20_s17   ;;  %s769_s16 = sphi %s809_s16, %s1052_s16   ;;  %s765_s15 = sphi %s807_s15, %s1051_s15   ;;  %s761_s14 = sphi %s805_s14, %s1050_s14   ;;  %s757_s13 = sphi %s803_s13, %s1049_s13   ;;  %s753_s12 = sphi %s801_s12, %s1048_s12  }
   0x8   : > { %p54_p0 = scmp.ne.s32.totalorder %s757_s13, %s753_s12  ;;  %p835_p1 = scmp.eq.s32.totalorder %s520_s18, 0 }
   0x9   : > { %p839_p2 = scmp.eq.s32.totalorder %s520_s18, 1  ;;  %p131_p3 = scmp.eq.s32.totalorder %s521_s19, 1 }
   0xa   : > { %s1033_s20 = scalar_select %p835_p1, 1, 0 }
   0xb   : > { %s1034_s21 = scalar_select %p839_p2, 1, 0 }
   0xc   : > { %p845_p4 = por %p835_p1, %p54_p0  ;;  %p522_p5 = scmp.ge.s32.totalorder %s773_s17, 1 }
   0xd   : > { %p850_p6 = por %p131_p3, %p54_p0  ;;  %p138_p7 = scmp.lt.s32.totalorder %s773_s17, 3 }
   0xe   : > { %s1035_s22 = scalar_select %p845_p4, 1, 0 }
   0xf   : > { %s1036_s23 = scalar_select %p850_p6, 1, 0 }
  0x10   : > { %p855_p8 = pnand %p522_p5, %p138_p7  ;;  %s775_s25 = smov [#allocation5]  }
  0x11   : > { %s154_s26 = sshll.u32 %s775_s25, 4  ;;  %s32_s28 = sadd.s32 1, %s769_s16  ;;  %s155_s26 = int_to_ptr.vmem [resolvable:$true] %s154_s26 }
  0x12   : > { %s1037_s24 = scalar_select %p855_p8, 1, 0 }
  0x13   : > { %p561_p9 = pneg %p855_p8  ;;  %s629_s4 = scalar_lea.hbm %s1026_s1, 2048 }
  0x14   : > { %p630_p12 = scmp.ne.s32.totalorder %s1026_s1, %s629_s4  ;;  %p636_p5 = scmp.lt.u32.totalorder %s629_s4, %s1026_s1 }
  0x15   : > { %p864_p11 = pnand %p561_p9, %p835_p1 }
  0x17   : > { %p631_p13 = pneg %p864_p11 }
  0x19   : > { %p632_p0 = pnand %p631_p13, %p630_p12 }
  0x1b   : > { %p633_p3 = pneg %p632_p0 }
  0x1d   : > { %p638_p7 = pnand %p636_p5, %p633_p3 }
  0x1f   : > { %641 = shalt.err (!%p638_p7)
}
  0x20   : > { %s642_s9 = scalar_lea.vmem %s155_s26, 2048  ;;  %p650_p1 = scmp.lt.s32.totalorder %s155_s26, %s155_s26 }
  0x21   : > { %p643_p9 = scmp.ne.s32.totalorder %s155_s26, %s642_s9  ;;  %p651_p4 = scmp.lt.s32.totalorder %s642_s9, %s642_s9 }
  0x23   : > { %p645_p10 = pnand %p643_p9, %p631_p13  ;;  %p652_p8 = por %p651_p4, %p650_p1 }
  0x25   : > { %p646_p6 = pneg %p645_p10 }
  0x27   : > { %p653_p2 = pnand %p652_p8, %p646_p6 }
  0x29   : > { %656 = shalt.err (!%p653_p2)
}
  0x2a   : > { %s776_s10 = smov 512   ;;  %s777_s11 = smov 32  }
  0x2b   : > { %564 = dma.hbm_to_vmem [thread:$0]  (!%p864_p11), %s1026_s1, 2048, %s155_s26, [#allocation6], %s776_s10, %s776_s10, %s777_s11  }
  0x2c   : > { %p34_p1 = scmp.ge.s32.totalorder %s32_s28, 2  ;;  %s41_s25 = sadd.s32 1, %s761_s14 }
  0x2d   : > { %p48_p2 = scmp.ne.s32.totalorder %s761_s14, %s757_s13  ;;  %p49_p4 = scmp.eq.s32.totalorder %s773_s17, 0 }
  0x2e   : > { %s1054_s28 = smov (%p34_p1, %s32_s28), 0  ;;  %p1040_p8 = scmp.ne.s32.totalorder %s1034_s21, 0 }
  0x2f   : > { %p891_p6 = por %p49_p4, %p48_p2  ;;  %s36_s27 = ssub.s32 %s769_s16, %s1054_s28 }
  0x30   : > { %p897_p10 = por %p1040_p8, %p48_p2  ;;  %p574_p12 = scmp.lt.s32.totalorder %s773_s17, 2 }
  0x31   : > { %p39_p11 = scmp.eq.s32.totalorder %s36_s27, 0  ;;  %s171_s26 = sand.u32 1, %s761_s14  }
  0x32   : > { %s525_s4 = sshll.u32 %s171_s26, 3  ;;  %s526_s6 = sshll.u32 %s769_s16, 7 }
  0x33   : > { %s906_s5 = scalar_select %p39_p11, %s761_s14, %s41_s25  }
  0x34   : > { %s912_s9 = scalar_lea.hbm %s1025_s0, %s526_s6  ;;  %s175_s21 = scalar_lea.vmem [#allocation2], %s525_s4 }
  0x35   : > { %s183_s10 = sshll.u32 %s175_s21, 4  ;;  %p918_p13 = pnand %p574_p12, %p891_p6  ;;  %s914_s10 = int_to_ptr.vmem [resolvable:$true] %s183_s10 }
  0x36   : > { %s172_s18 = scalar_lea.sflag [#allocation3], %s171_s26  ;;  %s657_s19 = scalar_lea.hbm %s912_s9, 128 }
  0x37   : > { %p658_p0 = scmp.ne.s32.totalorder %s912_s9, %s657_s19  ;;  %p659_p3 = pneg %p918_p13 }
  0x38   : > { %s662_s4 = scalar_lea.hbm %s1025_s0, 256  ;;  %p663_p9 = scmp.lt.u32.totalorder %s912_s9, %s1025_s0 }
  0x39   : > { %p660_p5 = pnand %p659_p3, %p658_p0  ;;  %p664_p1 = scmp.lt.u32.totalorder %s662_s4, %s657_s19 }
  0x3a   : > { %p666_p4 = scmp.lt.u32.totalorder %s657_s19, %s912_s9 }
  0x3b   : > { %p661_p7 = pneg %p660_p5  ;;  %p665_p2 = por %p664_p1, %p663_p9 }
  0x3d   : > { %p667_p6 = por %p666_p4, %p665_p2 }
  0x3f   : > { %p668_p8 = pnand %p667_p6, %p661_p7 }
  0x41   : > { %671 = shalt.err (!%p668_p8)
}
  0x42   : > { %s672_s26 = scalar_lea.vmem %s914_s10, 128  ;;  %s778_s7 = smov [#allocation2]  }
  0x43   : > { %p673_p12 = scmp.ne.s32.totalorder %s914_s10, %s672_s26  ;;  %s677_s8 = sshll.u32 %s778_s7, 4  ;;  %s678_s8 = int_to_ptr.vmem [resolvable:$false] %s677_s8 }
  0x44   : > { %s679_s21 = scalar_lea.vmem %s678_s8, 256  ;;  %p680_p5 = scmp.lt.s32.totalorder %s914_s10, %s678_s8 }
  0x45   : > { %p675_p11 = pnand %p673_p12, %p659_p3  ;;  %p681_p9 = scmp.lt.s32.totalorder %s679_s21, %s672_s26 }
  0x47   : > { %p676_p0 = pneg %p675_p11  ;;  %p682_p1 = por %p681_p9, %p680_p5 }
  0x49   : > { %p683_p2 = pnand %p682_p1, %p676_p0 }
  0x4b   : > { %686 = shalt.err (!%p683_p2)
}
  0x4c   : > { %568 = dma.hbm_to_vmem [thread:$0]  (!%p918_p13), %s912_s9, 128, %s914_s10, %s172_s18  }
  0x4d   : > { %p1043_p7 = scmp.ne.s32.totalorder %s1037_s24, 0 }
  0x4e   : > { %s950_s19 = sand.u32 (!%p1043_p7), 1, %s757_s13   ;;  %p1044_p3 = scmp.ne.s32.totalorder (!%p1043_p7), %s1035_s22, 0 }
  0x4f   : > { %192 = sbr.rel (%p1043_p7) target bundleno = 337 (0x151), region = 32  ;;  %s528_s25 = sshll.u32 (!%p1043_p7), %s950_s19, 3 }
  0x50   : > { %s195_s27 = scalar_lea.sflag (!%p1043_p7), [#allocation3], %s950_s19  ;;  %s956_s4 = scalar_lea.vmem (!%p1043_p7), [#allocation2], %s528_s25 }
  0x56   : > { %740 = dma.done.wait (%p1044_p3), %s195_s27, 128  }
  0x57   : > { %742 = vsyncadd (%p1044_p3), %s195_s27, 4294967168  ;;  %p1045_p13 = scmp.ne.s32.totalorder %s1033_s20, 0 }
  0x59   : > { %744 = dma.done.wait (%p1045_p13), [#allocation6], 2048  }
  0x5a   : > { %746 = vsyncadd (%p1045_p13), [#allocation6], 4294965248  ;;  %v779_v0 = vmov 0.0   ;;  %v228_v1 = vld [vmem:[#allocation5 + $0x8] sm:$0xff]  ;;  %v227_v3 = vld [vmem:[#allocation5] sm:$0xff]  ;;  %vm265_vm0 = vcmask 261120   ;;  %v245_v26 = vlaneseq }
  0x5b   : > { %333 = vmatprep.mubr.f32.mxu0 %v779_v0  ;;  %404 = vmatprep.mubr.f32.mxu1 %v779_v0  ;;  %v232_v2 = vld [vmem:[#allocation5 + $0x28] sm:$0xff]  ;;  %v231_v5 = vld [vmem:[#allocation5 + $0x20] sm:$0xff]  ;;  %v230_v6 = vld [vmem:[#allocation5 + $0x18] sm:$0xff]  ;;  %s534_s24 = sshll.u32 %s765_s15, 7  ;;  %s224_s9 = scalar_lea.vmem [#allocation7], %s528_s25 }
  0x5c   : > { %v537_v4 = vpack.c.bf16 %v232_v2, %v228_v1  ;;  %v234_v7 = vld [vmem:[#allocation5 + $0x38] sm:$0xff]  ;;  %v539_v8 = vpack.c.bf16 %v231_v5, %v227_v3  ;;  %v229_v10 = vld [vmem:[#allocation5 + $0x10] sm:$0xff]  ;;  %v236_v12 = vld [vmem:[#allocation5 + $0x48] sm:$0xff]  ;;  %v246_v27 = vshrl.u32 %v245_v26, 7  ;;  %s429_s10 = sshll.u32 %s224_s9, 4  ;;  %s976_s29 = scalar_lea.hbm %s1028_s3, %s534_s24  ;;  %s978_s10 = int_to_ptr.vmem [resolvable:$true] %s429_s10 }
  0x5d   : > { %v545_v9 = vpack.c.bf16 %v234_v7, %v230_v6  ;;  %v233_v11 = vld [vmem:[#allocation5 + $0x30] sm:$0xff]  ;;  %v240_v14 = vld [vmem:[#allocation5 + $0x68] sm:$0xff]  ;;  %v235_v15 = vld [vmem:[#allocation5 + $0x40] sm:$0xff]  ;;  %s416_s6 = scalar_lea.sflag [#allocation4], %s950_s19  ;;  %s687_s26 = scalar_lea.vmem %s978_s10, 128 }
  0x5e   : > { %538 = vmatprep.subr.bf16.mxu0 %v537_v4  ;;  %v547_v13 = vpack.c.bf16 %v233_v11, %v229_v10  ;;  %v239_v16 = vld [vmem:[#allocation5 + $0x60] sm:$0xff]  ;;  %v541_v17 = vpack.c.bf16 %v240_v14, %v236_v12  ;;  %v238_v19 = vld [vmem:[#allocation5 + $0x58] sm:$0xff]  ;;  %v237_v21 = vld [vmem:[#allocation5 + $0x50] sm:$0xff]  ;;  %v247_v28 = vsub.s32 0, %v246_v27  ;;  %v251_v30 = vsub.s32 1, %v246_v27  ;;  %p688_p4 = scmp.ne.s32.totalorder %s978_s10, %s687_s26  ;;  %s780_s15 = smov [#allocation7]  }
  0x5f   : > { %540 = vmatpush1.bf16.msra.mxu0 %v539_v8  ;;  %546 = vmatprep.subr.bf16.mxu1 %v545_v9  ;;  %v543_v18 = vpack.c.bf16 %v239_v16, %v235_v15  ;;  %v242_v20 = vld [vmem:[#allocation5 + $0x78] sm:$0xff]  ;;  %v241_v23 = vld [vmem:[#allocation5 + $0x70] sm:$0xff]  ;;  %v255_v31 = vsub.s32 2, %v246_v27  ;;  %v259_v35 = vsub.s32 3, %v246_v27  ;;  %s691_s7 = sshll.u32 %s780_s15, 4  ;;  %s692_s7 = int_to_ptr.vmem [resolvable:$false] %s691_s7 }
  0x60   : > { %548 = vmatpush1.bf16.msra.mxu1 %v547_v13  ;;  %v549_v22 = vpack.c.bf16 %v242_v20, %v238_v19  ;;  %542 = vmatprep.subr.bf16.mxu0 %v541_v17  ;;  %v551_v24 = vpack.c.bf16 %v241_v23, %v237_v21  ;;  %v226_v25 = vld [vmem:[%s956_s4] sm:$0xff]  ;;  %p689_p6 = pnand %p688_p4, %p897_p10  ;;  %s693_s8 = scalar_lea.vmem %s692_s7, 256 }
  0x61   : > { %v243_v29 = vld [vmem:[%s1027_s2] sm:$0xf]  ;;  %p694_p12 = scmp.lt.s32.totalorder %s978_s10, %s692_s7  ;;  %p695_p11 = scmp.lt.s32.totalorder %s693_s8, %s687_s26 }
  0x62   : > { %550 = vmatprep.subr.bf16.mxu1 %v549_v22  ;;  %v248_v32 = vrot.slane %v243_v29, %v247_v28  ;;  %v252_v33 = vrot.slane %v243_v29, %v251_v30  ;;  %v256_v34 = vrot.slane %v243_v29, %v255_v31  ;;  %v260_v42 = vrot.slane %v243_v29, %v259_v35  ;;  %p690_p8 = pneg %p689_p6 }
  0x63   : > { %544 = vmatpush1.bf16.msra.mxu0 %v543_v18  ;;  %p696_p0 = por %p695_p11, %p694_p12 }
  0x64   : > { %552 = vmatpush1.bf16.msra.mxu1 %v551_v24 }
  0x65   : > { %p697_p5 = pnand %p696_p0, %p690_p8 }
  0x66   : > { %531 = vmatmul.mubr.msk.f32.vlgmr.msra.gmra.mrb[0].mxu0 %vm265_vm0, %v226_v25 }
  0x67   : > { %532 = vmatmul.mubr.msk.f32.vlgmr.msra.gmra.mrb[0].mxu1 %vm265_vm0, %v226_v25 }
 0x139   : > { %v335_v36 = vpop.f32.mrb[0].mxu0 }
 0x13a   : > { %v336_v37 = vadd.f32 %v335_v36, %v248_v32  ;;  %v337_v38 = vpop.f32.mrb[1].mxu0  ;;  %v406_v39 = vpop.f32.mrb[0].mxu1 }
 0x13b   : > { %v338_v40 = vadd.f32 %v337_v38, %v252_v33  ;;  %v407_v41 = vadd.f32 %v406_v39, %v256_v34  ;;  %v408_v43 = vpop.f32.mrb[1].mxu1 }
 0x13c   : > { %v409_v46 = vadd.f32 %v408_v43, %v260_v42 }
 0x13d   : > { %v411_v44 = vmax.f32 %v336_v37, %v338_v40 }
 0x13f   : > { %v412_v45 = vmax.f32 %v411_v44, %v407_v41 }
 0x141   : > { %v413_v47 = vmax.f32 %v412_v45, %v409_v46 }
 0x143   : > { %414 = vst [vmem:[%s224_s9] sm:$0xff] %v413_v47 }
 0x144   : > { %700 = shalt.err (!%p697_p5)
}
 0x145   : > { %s701_s21 = scalar_lea.hbm %s976_s29, 128  ;;  %s705_s27 = scalar_lea.hbm %s1028_s3, 256 }
 0x146   : > { %p702_p9 = scmp.ne.s32.totalorder %s976_s29, %s701_s21  ;;  %p706_p7 = scmp.lt.u32.totalorder %s976_s29, %s1028_s3 }
 0x147   : > { %p707_p3 = scmp.lt.u32.totalorder %s705_s27, %s701_s21  ;;  %p709_p4 = scmp.lt.u32.totalorder %s701_s21, %s976_s29 }
 0x148   : > { %p703_p1 = pnand %p702_p9, %p897_p10 }
 0x149   : > { %p708_p13 = por %p707_p3, %p706_p7 }
 0x14a   : > { %p704_p2 = pneg %p703_p1 }
 0x14b   : > { %p710_p6 = por %p709_p4, %p708_p13 }
 0x14d   : > { %p711_p8 = pnand %p710_p6, %p704_p2 }
 0x14f   : > { %714 = shalt.err (!%p711_p8)
}
 0x150   : > { %559 = dma.vmem_to_hbm [thread:$0]  (%p897_p10), %s978_s10, 128, %s976_s29, %s416_s6  }
 0x151 PF: > { %s441_s22 = sand.u32 1, %s753_s12   ;;  %p1046_p12 = scmp.ne.s32.totalorder %s1036_s23, 0 }
 0x152   : > { %p1047_p11 = scmp.ge.s32.totalorder %s773_s17, 2  ;;  %s442_s24 = scalar_lea.sflag [#allocation4], %s441_s22 }
 0x154   : > { %p570_p0 = pnand %p1047_p11, %p1046_p12 }
 0x156   : > { %748 = dma.done.wait (!%p570_p0), %s442_s24, 128  }
 0x157   : > { %750 = vsyncadd (!%p570_p0), %s442_s24, 4294967168  ;;  %s20_s17 = sadd.s32 1, %s773_s17   ;;  %s1048_s12 = smov %s757_s13 }
 0x158   : > { %p17_p5 = scmp.ge.s32.totalorder %s20_s17, 4   ;;  %s1049_s13 = smov %s761_s14 }
 0x159   : > { %s1050_s14 = smov %s906_s5  ;;  %s1051_s15 = smov %s769_s16 }
 0x15a   : > { %s1052_s16 = smov %s1054_s28  ;;  %19 = sbr.rel (!%p17_p5) target bundleno = 7 (0x7), region = 82 }
 0x161   :  { %447 = vsyncpa [#allocation3], 1 }
 0x162   :  { %449 = vsyncpa [#allocation3 + $0x1], 1 }
 0x163   :  { %450 = vsyncpa [#allocation6], 1 }
 0x164   :  { %451 = vsyncpa [#allocation4], 1 }
 0x165   :  { %453 = vsyncpa [#allocation4 + $0x1], 1 }

</bundles_post_ra>
